<compile_context>
chip_gen: v5e
topology: v5e:2x2
jax: 0.10.0
libtpu: 0.0.40
codegen_flags: <defaults>
</compile_context>

<pallas_src>
import math
from functools import partial

import jax
import jax.numpy as jnp
from jax.experimental import pallas as pl
from jax.experimental.pallas import tpu as pltpu

LANES = 128


def _round_up(a, b):
    return ((a + b - 1) // b) * b


def _mlp_kernel(params_ref, x_ref, o_ref, *, hid, chunk):
    """params_ref: (3*hid+1,) f32 in SMEM, packed [w1, b1, w2, b2].
    x_ref / o_ref: (tile_rows, 128) f32 lane-dense batch slabs in VMEM."""
    # Hoist the 3*hid+1 scalar SMEM reads once per grid step (cheap sld's;
    # well under the 2-scalar-slots/bundle budget of the compute loop).
    w1 = [params_ref[h] for h in range(hid)]
    b1 = [params_ref[hid + h] for h in range(hid)]
    w2 = [params_ref[2 * hid + h] for h in range(hid)]
    b2 = params_ref[3 * hid]

    tile_rows = x_ref.shape[0]
    # Static chunking: per chunk only x, acc and one temp are live
    # (~3 * chunk/8 vregs <= 24), so the unrolled hidden loop never spills.
    for r0 in range(0, tile_rows, chunk):
        x = x_ref[r0:r0 + chunk, :]                       # (chunk, 128) f32
        # Fold b2 and the h=0 contribution into the accumulator init
        # (saves one full-tile VALU add per chunk vs zeros-init + "+ b2").
        acc = jnp.maximum(x * w1[0] + b1[0], 0.0) * w2[0] + b2
        for h in range(1, hid):                           # VPU-only, unrolled
            acc = acc + jnp.maximum(x * w1[h] + b1[h], 0.0) * w2[h]
        o_ref[r0:r0 + chunk, :] = acc


def pack_params(w1, b1, w2, b2):
    """Pack the 3*H+1 parameters into one SMEM-resident f32 vector.
    Call once; weights are static across forward calls."""
    return jnp.concatenate(
        [w1.reshape(-1), b1.reshape(-1), w2.reshape(-1), b2.reshape(-1)]
    ).astype(jnp.float32)


@partial(jax.jit, static_argnames=("hid", "max_tile_rows"))
def net_forward(x, params, *, hid, max_tile_rows=2048):
    """x: (N, 1) f32; params: packed (3*hid+1,) f32 from pack_params().
    Returns (N, 1) f32 == predict(relu(hidden(x)))."""
    n, in_f = x.shape
    assert in_f == 1, "hidden layer expects 1 input feature"

    # Lane-dense slab: batch spread over (sublanes, lanes) = (rows, 128).
    rows = _round_up(pl.cdiv(n, LANES), 8)
    # Split into >=2 grid programs only when there is enough work (rows>=64)
    # to amortize the ~0.35us grid-step overhead; small batches stay a single
    # program (no wasted step on 1-TC v5e/v6e), large batches give both v7x
    # TensorCores a share via the "parallel" axis.
    if rows >= 64:
        tile_rows = min(max_tile_rows, _round_up(pl.cdiv(rows, 2), 8))
    else:
        tile_rows = rows
    grid_m = pl.cdiv(rows, tile_rows)
    rows = grid_m * tile_rows
    total = rows * LANES

    # TODO(synk): at very large N the pad/reshape + final slice add two extra
    # slab copies; a lane-dense (rows,128) public layout would remove them.
    x_slab = jnp.pad(x.reshape(-1), (0, total - n)).reshape(rows, LANES)
    chunk = math.gcd(tile_rows, 64)                       # multiple of 8

    out_slab = pl.pallas_call(
        partial(_mlp_kernel, hid=hid, chunk=chunk),
        out_shape=jax.ShapeDtypeStruct((rows, LANES), jnp.float32),
        grid=(grid_m,),
        in_specs=[
            pl.BlockSpec(memory_space=pltpu.MemorySpace.SMEM),    # packed params
            pl.BlockSpec((tile_rows, LANES), lambda i: (i, 0)),   # x slab
        ],
        out_specs=pl.BlockSpec((tile_rows, LANES), lambda i: (i, 0)),
        compiler_params=pltpu.CompilerParams(
            dimension_semantics=("parallel",)),
    )(params, x_slab)

    # Drop padding and restore the (N, 1) column layout of nn.Linear.
    return out_slab.reshape(-1)[:n, None]


if __name__ == "__main__":
    # Deterministic parameter init mirroring the nn.Linear shapes
    # (weights stored transposed: (in_features, out_features)).
    key = jax.random.PRNGKey(0)
    k1, k2, k3, k4 = jax.random.split(key, 4)
    in_f, hid, out_f = 1, 20, 1
    bound1 = 1.0 / math.sqrt(in_f)
    bound2 = 1.0 / math.sqrt(hid)
    w1 = jax.random.uniform(k1, (in_f, hid), jnp.float32, -bound1, bound1)
    b1 = jax.random.uniform(k2, (1, hid), jnp.float32, -bound1, bound1)
    w2 = jax.random.uniform(k3, (hid, out_f), jnp.float32, -bound2, bound2)
    b2 = jax.random.uniform(k4, (1, out_f), jnp.float32, -bound2, bound2)

    # Input consistent with the reference script: x = linspace(-1, 1, 1000)[:, None]
    N = 1000
    x = jnp.linspace(-1.0, 1.0, N, dtype=jnp.float32)[:, None]

    # Pack parameters ONCE (hoisted out of the per-call path).
    params = pack_params(w1, b1, w2, b2)

    out = jax.block_until_ready(net_forward(x, params, hid=hid))

    # Pure-JAX reference check.
    ref = jnp.maximum(x @ w1 + b1, 0.0) @ w2 + b2
    assert out.shape == (N, 1)
    assert jnp.allclose(out, ref, atol=1e-5, rtol=1e-5)

    print("KERNEL_OK")
</pallas_src>

<mosaic_0001>
module attributes {stable_mosaic.version = 11 : i64} {
  func.func @_mlp_kernel(%arg0: i32, %arg1: memref<61xf32, #tpu.memory_space<smem>>, %arg2: memref<8x128xf32, #tpu.memory_space<vmem>>, %arg3: memref<8x128xf32, #tpu.memory_space<vmem>>) attributes {dimension_semantics = [#tpu.dimension_semantics<parallel>], iteration_bounds = array<i64: 1>, scalar_prefetch = 0 : i64, scratch_operands = 0 : i64, tpu.core_type = #tpu.core_type<tc>, window_params = [{transform_indices = @transform_0, window_bounds = array<i64: 61>}, {transform_indices = @transform_1, window_bounds = array<i64: 8, 128>}, {transform_indices = @transform_2, window_bounds = array<i64: 8, 128>}]} {
    %c0 = arith.constant 0 : index
    %0 = memref.load %arg1[%c0] : memref<61xf32, #tpu.memory_space<smem>>
    %c1 = arith.constant 1 : index
    %1 = memref.load %arg1[%c1] : memref<61xf32, #tpu.memory_space<smem>>
    %c2 = arith.constant 2 : index
    %2 = memref.load %arg1[%c2] : memref<61xf32, #tpu.memory_space<smem>>
    %c3 = arith.constant 3 : index
    %3 = memref.load %arg1[%c3] : memref<61xf32, #tpu.memory_space<smem>>
    %c4 = arith.constant 4 : index
    %4 = memref.load %arg1[%c4] : memref<61xf32, #tpu.memory_space<smem>>
    %c5 = arith.constant 5 : index
    %5 = memref.load %arg1[%c5] : memref<61xf32, #tpu.memory_space<smem>>
    %c6 = arith.constant 6 : index
    %6 = memref.load %arg1[%c6] : memref<61xf32, #tpu.memory_space<smem>>
    %c7 = arith.constant 7 : index
    %7 = memref.load %arg1[%c7] : memref<61xf32, #tpu.memory_space<smem>>
    %c8 = arith.constant 8 : index
    %8 = memref.load %arg1[%c8] : memref<61xf32, #tpu.memory_space<smem>>
    %c9 = arith.constant 9 : index
    %9 = memref.load %arg1[%c9] : memref<61xf32, #tpu.memory_space<smem>>
    %c10 = arith.constant 10 : index
    %10 = memref.load %arg1[%c10] : memref<61xf32, #tpu.memory_space<smem>>
    %c11 = arith.constant 11 : index
    %11 = memref.load %arg1[%c11] : memref<61xf32, #tpu.memory_space<smem>>
    %c12 = arith.constant 12 : index
    %12 = memref.load %arg1[%c12] : memref<61xf32, #tpu.memory_space<smem>>
    %c13 = arith.constant 13 : index
    %13 = memref.load %arg1[%c13] : memref<61xf32, #tpu.memory_space<smem>>
    %c14 = arith.constant 14 : index
    %14 = memref.load %arg1[%c14] : memref<61xf32, #tpu.memory_space<smem>>
    %c15 = arith.constant 15 : index
    %15 = memref.load %arg1[%c15] : memref<61xf32, #tpu.memory_space<smem>>
    %c16 = arith.constant 16 : index
    %16 = memref.load %arg1[%c16] : memref<61xf32, #tpu.memory_space<smem>>
    %c17 = arith.constant 17 : index
    %17 = memref.load %arg1[%c17] : memref<61xf32, #tpu.memory_space<smem>>
    %c18 = arith.constant 18 : index
    %18 = memref.load %arg1[%c18] : memref<61xf32, #tpu.memory_space<smem>>
    %c19 = arith.constant 19 : index
    %19 = memref.load %arg1[%c19] : memref<61xf32, #tpu.memory_space<smem>>
    %c20 = arith.constant 20 : index
    %20 = memref.load %arg1[%c20] : memref<61xf32, #tpu.memory_space<smem>>
    %c21 = arith.constant 21 : index
    %21 = memref.load %arg1[%c21] : memref<61xf32, #tpu.memory_space<smem>>
    %c22 = arith.constant 22 : index
    %22 = memref.load %arg1[%c22] : memref<61xf32, #tpu.memory_space<smem>>
    %c23 = arith.constant 23 : index
    %23 = memref.load %arg1[%c23] : memref<61xf32, #tpu.memory_space<smem>>
    %c24 = arith.constant 24 : index
    %24 = memref.load %arg1[%c24] : memref<61xf32, #tpu.memory_space<smem>>
    %c25 = arith.constant 25 : index
    %25 = memref.load %arg1[%c25] : memref<61xf32, #tpu.memory_space<smem>>
    %c26 = arith.constant 26 : index
    %26 = memref.load %arg1[%c26] : memref<61xf32, #tpu.memory_space<smem>>
    %c27 = arith.constant 27 : index
    %27 = memref.load %arg1[%c27] : memref<61xf32, #tpu.memory_space<smem>>
    %c28 = arith.constant 28 : index
    %28 = memref.load %arg1[%c28] : memref<61xf32, #tpu.memory_space<smem>>
    %c29 = arith.constant 29 : index
    %29 = memref.load %arg1[%c29] : memref<61xf32, #tpu.memory_space<smem>>
    %c30 = arith.constant 30 : index
    %30 = memref.load %arg1[%c30] : memref<61xf32, #tpu.memory_space<smem>>
    %c31 = arith.constant 31 : index
    %31 = memref.load %arg1[%c31] : memref<61xf32, #tpu.memory_space<smem>>
    %c32 = arith.constant 32 : index
    %32 = memref.load %arg1[%c32] : memref<61xf32, #tpu.memory_space<smem>>
    %c33 = arith.constant 33 : index
    %33 = memref.load %arg1[%c33] : memref<61xf32, #tpu.memory_space<smem>>
    %c34 = arith.constant 34 : index
    %34 = memref.load %arg1[%c34] : memref<61xf32, #tpu.memory_space<smem>>
    %c35 = arith.constant 35 : index
    %35 = memref.load %arg1[%c35] : memref<61xf32, #tpu.memory_space<smem>>
    %c36 = arith.constant 36 : index
    %36 = memref.load %arg1[%c36] : memref<61xf32, #tpu.memory_space<smem>>
    %c37 = arith.constant 37 : index
    %37 = memref.load %arg1[%c37] : memref<61xf32, #tpu.memory_space<smem>>
    %c38 = arith.constant 38 : index
    %38 = memref.load %arg1[%c38] : memref<61xf32, #tpu.memory_space<smem>>
    %c39 = arith.constant 39 : index
    %39 = memref.load %arg1[%c39] : memref<61xf32, #tpu.memory_space<smem>>
    %c40 = arith.constant 40 : index
    %40 = memref.load %arg1[%c40] : memref<61xf32, #tpu.memory_space<smem>>
    %c41 = arith.constant 41 : index
    %41 = memref.load %arg1[%c41] : memref<61xf32, #tpu.memory_space<smem>>
    %c42 = arith.constant 42 : index
    %42 = memref.load %arg1[%c42] : memref<61xf32, #tpu.memory_space<smem>>
    %c43 = arith.constant 43 : index
    %43 = memref.load %arg1[%c43] : memref<61xf32, #tpu.memory_space<smem>>
    %c44 = arith.constant 44 : index
    %44 = memref.load %arg1[%c44] : memref<61xf32, #tpu.memory_space<smem>>
    %c45 = arith.constant 45 : index
    %45 = memref.load %arg1[%c45] : memref<61xf32, #tpu.memory_space<smem>>
    %c46 = arith.constant 46 : index
    %46 = memref.load %arg1[%c46] : memref<61xf32, #tpu.memory_space<smem>>
    %c47 = arith.constant 47 : index
    %47 = memref.load %arg1[%c47] : memref<61xf32, #tpu.memory_space<smem>>
    %c48 = arith.constant 48 : index
    %48 = memref.load %arg1[%c48] : memref<61xf32, #tpu.memory_space<smem>>
    %c49 = arith.constant 49 : index
    %49 = memref.load %arg1[%c49] : memref<61xf32, #tpu.memory_space<smem>>
    %c50 = arith.constant 50 : index
    %50 = memref.load %arg1[%c50] : memref<61xf32, #tpu.memory_space<smem>>
    %c51 = arith.constant 51 : index
    %51 = memref.load %arg1[%c51] : memref<61xf32, #tpu.memory_space<smem>>
    %c52 = arith.constant 52 : index
    %52 = memref.load %arg1[%c52] : memref<61xf32, #tpu.memory_space<smem>>
    %c53 = arith.constant 53 : index
    %53 = memref.load %arg1[%c53] : memref<61xf32, #tpu.memory_space<smem>>
    %c54 = arith.constant 54 : index
    %54 = memref.load %arg1[%c54] : memref<61xf32, #tpu.memory_space<smem>>
    %c55 = arith.constant 55 : index
    %55 = memref.load %arg1[%c55] : memref<61xf32, #tpu.memory_space<smem>>
    %c56 = arith.constant 56 : index
    %56 = memref.load %arg1[%c56] : memref<61xf32, #tpu.memory_space<smem>>
    %c57 = arith.constant 57 : index
    %57 = memref.load %arg1[%c57] : memref<61xf32, #tpu.memory_space<smem>>
    %c58 = arith.constant 58 : index
    %58 = memref.load %arg1[%c58] : memref<61xf32, #tpu.memory_space<smem>>
    %c59 = arith.constant 59 : index
    %59 = memref.load %arg1[%c59] : memref<61xf32, #tpu.memory_space<smem>>
    %c60 = arith.constant 60 : index
    %60 = memref.load %arg1[%c60] : memref<61xf32, #tpu.memory_space<smem>>
    %c0_0 = arith.constant 0 : index
    %c0_1 = arith.constant 0 : index
    %61 = vector.load %arg2[%c0_0, %c0_1] : memref<8x128xf32, #tpu.memory_space<vmem>>, vector<8x128xf32>
    %62 = vector.broadcast %0 : f32 to vector<8x128xf32>
    %63 = arith.mulf %61, %62 : vector<8x128xf32>
    %64 = vector.broadcast %20 : f32 to vector<8x128xf32>
    %65 = arith.addf %63, %64 : vector<8x128xf32>
    %cst = arith.constant 0.000000e+00 : f32
    %66 = vector.broadcast %cst : f32 to vector<8x128xf32>
    %67 = arith.maximumf %65, %66 : vector<8x128xf32>
    %68 = vector.broadcast %40 : f32 to vector<8x128xf32>
    %69 = arith.mulf %67, %68 : vector<8x128xf32>
    %70 = vector.broadcast %60 : f32 to vector<8x128xf32>
    %71 = arith.addf %69, %70 : vector<8x128xf32>
    %72 = vector.broadcast %1 : f32 to vector<8x128xf32>
    %73 = arith.mulf %61, %72 : vector<8x128xf32>
    %74 = vector.broadcast %21 : f32 to vector<8x128xf32>
    %75 = arith.addf %73, %74 : vector<8x128xf32>
    %cst_2 = arith.constant 0.000000e+00 : f32
    %76 = vector.broadcast %cst_2 : f32 to vector<8x128xf32>
    %77 = arith.maximumf %75, %76 : vector<8x128xf32>
    %78 = vector.broadcast %41 : f32 to vector<8x128xf32>
    %79 = arith.mulf %77, %78 : vector<8x128xf32>
    %80 = arith.addf %71, %79 : vector<8x128xf32>
    %81 = vector.broadcast %2 : f32 to vector<8x128xf32>
    %82 = arith.mulf %61, %81 : vector<8x128xf32>
    %83 = vector.broadcast %22 : f32 to vector<8x128xf32>
    %84 = arith.addf %82, %83 : vector<8x128xf32>
    %cst_3 = arith.constant 0.000000e+00 : f32
    %85 = vector.broadcast %cst_3 : f32 to vector<8x128xf32>
    %86 = arith.maximumf %84, %85 : vector<8x128xf32>
    %87 = vector.broadcast %42 : f32 to vector<8x128xf32>
    %88 = arith.mulf %86, %87 : vector<8x128xf32>
    %89 = arith.addf %80, %88 : vector<8x128xf32>
    %90 = vector.broadcast %3 : f32 to vector<8x128xf32>
    %91 = arith.mulf %61, %90 : vector<8x128xf32>
    %92 = vector.broadcast %23 : f32 to vector<8x128xf32>
    %93 = arith.addf %91, %92 : vector<8x128xf32>
    %cst_4 = arith.constant 0.000000e+00 : f32
    %94 = vector.broadcast %cst_4 : f32 to vector<8x128xf32>
    %95 = arith.maximumf %93, %94 : vector<8x128xf32>
    %96 = vector.broadcast %43 : f32 to vector<8x128xf32>
    %97 = arith.mulf %95, %96 : vector<8x128xf32>
    %98 = arith.addf %89, %97 : vector<8x128xf32>
    %99 = vector.broadcast %4 : f32 to vector<8x128xf32>
    %100 = arith.mulf %61, %99 : vector<8x128xf32>
    %101 = vector.broadcast %24 : f32 to vector<8x128xf32>
    %102 = arith.addf %100, %101 : vector<8x128xf32>
    %cst_5 = arith.constant 0.000000e+00 : f32
    %103 = vector.broadcast %cst_5 : f32 to vector<8x128xf32>
    %104 = arith.maximumf %102, %103 : vector<8x128xf32>
    %105 = vector.broadcast %44 : f32 to vector<8x128xf32>
    %106 = arith.mulf %104, %105 : vector<8x128xf32>
    %107 = arith.addf %98, %106 : vector<8x128xf32>
    %108 = vector.broadcast %5 : f32 to vector<8x128xf32>
    %109 = arith.mulf %61, %108 : vector<8x128xf32>
    %110 = vector.broadcast %25 : f32 to vector<8x128xf32>
    %111 = arith.addf %109, %110 : vector<8x128xf32>
    %cst_6 = arith.constant 0.000000e+00 : f32
    %112 = vector.broadcast %cst_6 : f32 to vector<8x128xf32>
    %113 = arith.maximumf %111, %112 : vector<8x128xf32>
    %114 = vector.broadcast %45 : f32 to vector<8x128xf32>
    %115 = arith.mulf %113, %114 : vector<8x128xf32>
    %116 = arith.addf %107, %115 : vector<8x128xf32>
    %117 = vector.broadcast %6 : f32 to vector<8x128xf32>
    %118 = arith.mulf %61, %117 : vector<8x128xf32>
    %119 = vector.broadcast %26 : f32 to vector<8x128xf32>
    %120 = arith.addf %118, %119 : vector<8x128xf32>
    %cst_7 = arith.constant 0.000000e+00 : f32
    %121 = vector.broadcast %cst_7 : f32 to vector<8x128xf32>
    %122 = arith.maximumf %120, %121 : vector<8x128xf32>
    %123 = vector.broadcast %46 : f32 to vector<8x128xf32>
    %124 = arith.mulf %122, %123 : vector<8x128xf32>
    %125 = arith.addf %116, %124 : vector<8x128xf32>
    %126 = vector.broadcast %7 : f32 to vector<8x128xf32>
    %127 = arith.mulf %61, %126 : vector<8x128xf32>
    %128 = vector.broadcast %27 : f32 to vector<8x128xf32>
    %129 = arith.addf %127, %128 : vector<8x128xf32>
    %cst_8 = arith.constant 0.000000e+00 : f32
    %130 = vector.broadcast %cst_8 : f32 to vector<8x128xf32>
    %131 = arith.maximumf %129, %130 : vector<8x128xf32>
    %132 = vector.broadcast %47 : f32 to vector<8x128xf32>
    %133 = arith.mulf %131, %132 : vector<8x128xf32>
    %134 = arith.addf %125, %133 : vector<8x128xf32>
    %135 = vector.broadcast %8 : f32 to vector<8x128xf32>
    %136 = arith.mulf %61, %135 : vector<8x128xf32>
    %137 = vector.broadcast %28 : f32 to vector<8x128xf32>
    %138 = arith.addf %136, %137 : vector<8x128xf32>
    %cst_9 = arith.constant 0.000000e+00 : f32
    %139 = vector.broadcast %cst_9 : f32 to vector<8x128xf32>
    %140 = arith.maximumf %138, %139 : vector<8x128xf32>
    %141 = vector.broadcast %48 : f32 to vector<8x128xf32>
    %142 = arith.mulf %140, %141 : vector<8x128xf32>
    %143 = arith.addf %134, %142 : vector<8x128xf32>
    %144 = vector.broadcast %9 : f32 to vector<8x128xf32>
    %145 = arith.mulf %61, %144 : vector<8x128xf32>
    %146 = vector.broadcast %29 : f32 to vector<8x128xf32>
    %147 = arith.addf %145, %146 : vector<8x128xf32>
    %cst_10 = arith.constant 0.000000e+00 : f32
    %148 = vector.broadcast %cst_10 : f32 to vector<8x128xf32>
    %149 = arith.maximumf %147, %148 : vector<8x128xf32>
    %150 = vector.broadcast %49 : f32 to vector<8x128xf32>
    %151 = arith.mulf %149, %150 : vector<8x128xf32>
    %152 = arith.addf %143, %151 : vector<8x128xf32>
    %153 = vector.broadcast %10 : f32 to vector<8x128xf32>
    %154 = arith.mulf %61, %153 : vector<8x128xf32>
    %155 = vector.broadcast %30 : f32 to vector<8x128xf32>
    %156 = arith.addf %154, %155 : vector<8x128xf32>
    %cst_11 = arith.constant 0.000000e+00 : f32
    %157 = vector.broadcast %cst_11 : f32 to vector<8x128xf32>
    %158 = arith.maximumf %156, %157 : vector<8x128xf32>
    %159 = vector.broadcast %50 : f32 to vector<8x128xf32>
    %160 = arith.mulf %158, %159 : vector<8x128xf32>
    %161 = arith.addf %152, %160 : vector<8x128xf32>
    %162 = vector.broadcast %11 : f32 to vector<8x128xf32>
    %163 = arith.mulf %61, %162 : vector<8x128xf32>
    %164 = vector.broadcast %31 : f32 to vector<8x128xf32>
    %165 = arith.addf %163, %164 : vector<8x128xf32>
    %cst_12 = arith.constant 0.000000e+00 : f32
    %166 = vector.broadcast %cst_12 : f32 to vector<8x128xf32>
    %167 = arith.maximumf %165, %166 : vector<8x128xf32>
    %168 = vector.broadcast %51 : f32 to vector<8x128xf32>
    %169 = arith.mulf %167, %168 : vector<8x128xf32>
    %170 = arith.addf %161, %169 : vector<8x128xf32>
    %171 = vector.broadcast %12 : f32 to vector<8x128xf32>
    %172 = arith.mulf %61, %171 : vector<8x128xf32>
    %173 = vector.broadcast %32 : f32 to vector<8x128xf32>
    %174 = arith.addf %172, %173 : vector<8x128xf32>
    %cst_13 = arith.constant 0.000000e+00 : f32
    %175 = vector.broadcast %cst_13 : f32 to vector<8x128xf32>
    %176 = arith.maximumf %174, %175 : vector<8x128xf32>
    %177 = vector.broadcast %52 : f32 to vector<8x128xf32>
    %178 = arith.mulf %176, %177 : vector<8x128xf32>
    %179 = arith.addf %170, %178 : vector<8x128xf32>
    %180 = vector.broadcast %13 : f32 to vector<8x128xf32>
    %181 = arith.mulf %61, %180 : vector<8x128xf32>
    %182 = vector.broadcast %33 : f32 to vector<8x128xf32>
    %183 = arith.addf %181, %182 : vector<8x128xf32>
    %cst_14 = arith.constant 0.000000e+00 : f32
    %184 = vector.broadcast %cst_14 : f32 to vector<8x128xf32>
    %185 = arith.maximumf %183, %184 : vector<8x128xf32>
    %186 = vector.broadcast %53 : f32 to vector<8x128xf32>
    %187 = arith.mulf %185, %186 : vector<8x128xf32>
    %188 = arith.addf %179, %187 : vector<8x128xf32>
    %189 = vector.broadcast %14 : f32 to vector<8x128xf32>
    %190 = arith.mulf %61, %189 : vector<8x128xf32>
    %191 = vector.broadcast %34 : f32 to vector<8x128xf32>
    %192 = arith.addf %190, %191 : vector<8x128xf32>
    %cst_15 = arith.constant 0.000000e+00 : f32
    %193 = vector.broadcast %cst_15 : f32 to vector<8x128xf32>
    %194 = arith.maximumf %192, %193 : vector<8x128xf32>
    %195 = vector.broadcast %54 : f32 to vector<8x128xf32>
    %196 = arith.mulf %194, %195 : vector<8x128xf32>
    %197 = arith.addf %188, %196 : vector<8x128xf32>
    %198 = vector.broadcast %15 : f32 to vector<8x128xf32>
    %199 = arith.mulf %61, %198 : vector<8x128xf32>
    %200 = vector.broadcast %35 : f32 to vector<8x128xf32>
    %201 = arith.addf %199, %200 : vector<8x128xf32>
    %cst_16 = arith.constant 0.000000e+00 : f32
    %202 = vector.broadcast %cst_16 : f32 to vector<8x128xf32>
    %203 = arith.maximumf %201, %202 : vector<8x128xf32>
    %204 = vector.broadcast %55 : f32 to vector<8x128xf32>
    %205 = arith.mulf %203, %204 : vector<8x128xf32>
    %206 = arith.addf %197, %205 : vector<8x128xf32>
    %207 = vector.broadcast %16 : f32 to vector<8x128xf32>
    %208 = arith.mulf %61, %207 : vector<8x128xf32>
    %209 = vector.broadcast %36 : f32 to vector<8x128xf32>
    %210 = arith.addf %208, %209 : vector<8x128xf32>
    %cst_17 = arith.constant 0.000000e+00 : f32
    %211 = vector.broadcast %cst_17 : f32 to vector<8x128xf32>
    %212 = arith.maximumf %210, %211 : vector<8x128xf32>
    %213 = vector.broadcast %56 : f32 to vector<8x128xf32>
    %214 = arith.mulf %212, %213 : vector<8x128xf32>
    %215 = arith.addf %206, %214 : vector<8x128xf32>
    %216 = vector.broadcast %17 : f32 to vector<8x128xf32>
    %217 = arith.mulf %61, %216 : vector<8x128xf32>
    %218 = vector.broadcast %37 : f32 to vector<8x128xf32>
    %219 = arith.addf %217, %218 : vector<8x128xf32>
    %cst_18 = arith.constant 0.000000e+00 : f32
    %220 = vector.broadcast %cst_18 : f32 to vector<8x128xf32>
    %221 = arith.maximumf %219, %220 : vector<8x128xf32>
    %222 = vector.broadcast %57 : f32 to vector<8x128xf32>
    %223 = arith.mulf %221, %222 : vector<8x128xf32>
    %224 = arith.addf %215, %223 : vector<8x128xf32>
    %225 = vector.broadcast %18 : f32 to vector<8x128xf32>
    %226 = arith.mulf %61, %225 : vector<8x128xf32>
    %227 = vector.broadcast %38 : f32 to vector<8x128xf32>
    %228 = arith.addf %226, %227 : vector<8x128xf32>
    %cst_19 = arith.constant 0.000000e+00 : f32
    %229 = vector.broadcast %cst_19 : f32 to vector<8x128xf32>
    %230 = arith.maximumf %228, %229 : vector<8x128xf32>
    %231 = vector.broadcast %58 : f32 to vector<8x128xf32>
    %232 = arith.mulf %230, %231 : vector<8x128xf32>
    %233 = arith.addf %224, %232 : vector<8x128xf32>
    %234 = vector.broadcast %19 : f32 to vector<8x128xf32>
    %235 = arith.mulf %61, %234 : vector<8x128xf32>
    %236 = vector.broadcast %39 : f32 to vector<8x128xf32>
    %237 = arith.addf %235, %236 : vector<8x128xf32>
    %cst_20 = arith.constant 0.000000e+00 : f32
    %238 = vector.broadcast %cst_20 : f32 to vector<8x128xf32>
    %239 = arith.maximumf %237, %238 : vector<8x128xf32>
    %240 = vector.broadcast %59 : f32 to vector<8x128xf32>
    %241 = arith.mulf %239, %240 : vector<8x128xf32>
    %242 = arith.addf %233, %241 : vector<8x128xf32>
    %c0_21 = arith.constant 0 : index
    %c0_22 = arith.constant 0 : index
    %243 = vector.load %arg3[%c0_21, %c0_22] : memref<8x128xf32, #tpu.memory_space<vmem>>, vector<8x128xf32>
    tpu.vector_store %arg3[%c0_21, %c0_22], %242 {strides = array<i32>} : memref<8x128xf32, #tpu.memory_space<vmem>>, vector<8x128xf32>,
    return
  }
  func.func @transform_0(%arg0: i32) -> i32 {
    %c0_i32 = arith.constant 0 : i32
    %c0_i32_0 = arith.constant 0 : i32
    return %c0_i32 : i32
  }
  func.func @transform_1(%arg0: i32) -> (i32, i32) {
    %c0_i32 = arith.constant 0 : i32
    %c0_i32_0 = arith.constant 0 : i32
    return %arg0, %c0_i32 : i32, i32
  }
  func.func @transform_2(%arg0: i32) -> (i32, i32) {
    %c0_i32 = arith.constant 0 : i32
    %c0_i32_0 = arith.constant 0 : i32
    return %arg0, %c0_i32 : i32, i32
  }
}

</mosaic_0001>

<bundles_post_ra>
// kernel: net_forward.1
= control target key start
LH: loop header
LB: loop body
LE: loop exit
PB: predicated region body
PF: predicated region fallthrough
CT: control target
= control target key end

     0   :  { %7 = vsyncpa [#allocation4], 0  ;;  %s584_s0 = inlined_call_operand.vmem [shape: f32[61], index: 0, kind: input, shape index: {}]   ;;  %s585_s1 = inlined_call_operand.vmem [shape: f32[8,128], index: 1, kind: input, shape index: {}]   ;;  %s586_s2 = inlined_call_operand.hbm [shape: f32[8,128], index: 2, kind: output, shape index: {}]  }
   0x1   :  { %8 = vsyncpa [#allocation3], 0  ;;  %s14_s11 = sshll.u32 %s584_s0, 4  ;;  %s368_s12 = smov [#allocation2]   ;;  %s15_s11 = int_to_ptr.vmem [resolvable:$true] %s14_s11 }
   0x2   :  { %17 = dma.vmem_to_smem %s15_s11, 16, %s368_s12, [#allocation4]  }
   0x3   :  { %364 = dma.done.wait [#allocation4], 16  }
   0x4   :  { %365 = vsyncadd [#allocation4], 4294967280 }
   0x5   :  { %24 = sfence }
   0x6   :  { %s25_s13 = sld [smem:[#allocation2]]  ;;  %v431_v0 = vld [vmem:[%s585_s1] sm:$0xff] }
   0x7   :  { %s388_s14 = sld [smem:[#allocation2 + $0x1]] }
   0x8   :  { %s390_s15 = sld [smem:[#allocation2 + $0x2]] }
   0x9   :  { %s392_s16 = sld [smem:[#allocation2 + $0x3]] }
   0xa   :  { %s394_s17 = sld [smem:[#allocation2 + $0x4]] }
   0xb   :  { %s396_s18 = sld [smem:[#allocation2 + $0x5]] }
   0xc   :  { %s398_s19 = sld [smem:[#allocation2 + $0x6]]  ;;  %v87_v1 = vstv %s25_s13 }
   0xd   :  { %s400_s0 = sld [smem:[#allocation2 + $0x7]]  ;;  %v96_v2 = vstv %s388_s14  ;;  %v88_v3 = vmul.f32 %v87_v1, %v431_v0 }
   0xe   :  { %s402_s20 = sld [smem:[#allocation2 + $0x8]]  ;;  %v104_v5 = vstv %s390_s15  ;;  %v97_v6 = vmul.f32 %v96_v2, %v431_v0 }
   0xf   :  { %s404_s21 = sld [smem:[#allocation2 + $0x9]]  ;;  %v112_v7 = vstv %s392_s16  ;;  %v105_v11 = vmul.f32 %v104_v5, %v431_v0 }
  0x10   :  { %s406_s22 = sld [smem:[#allocation2 + $0xa]]  ;;  %v120_v9 = vstv %s394_s17  ;;  %v113_v13 = vmul.f32 %v112_v7, %v431_v0 }
  0x11   :  { %s408_s23 = sld [smem:[#allocation2 + $0xb]]  ;;  %v121_v16 = vmul.f32 %v120_v9, %v431_v0  ;;  %v128_v17 = vstv %s396_s18 }
  0x12   :  { %s410_s24 = sld [smem:[#allocation2 + $0xc]]  ;;  %v136_v21 = vstv %s398_s19  ;;  %v129_v24 = vmul.f32 %v128_v17, %v431_v0 }
  0x13   :  { %s412_s25 = sld [smem:[#allocation2 + $0xd]]  ;;  %v144_v28 = vstv %s400_s0  ;;  %v137_v30 = vmul.f32 %v136_v21, %v431_v0 }
  0x14   :  { %s414_s26 = sld [smem:[#allocation2 + $0xe]]  ;;  %v152_v34 = vstv %s402_s20  ;;  %v145_v38 = vmul.f32 %v144_v28, %v431_v0 }
  0x15   :  { %s416_s27 = sld [smem:[#allocation2 + $0xf]]  ;;  %v160_v42 = vstv %s404_s21  ;;  %v153_v46 = vmul.f32 %v152_v34, %v431_v0 }
  0x16   :  { %s418_s28 = sld [smem:[#allocation2 + $0x10]]  ;;  %v168_v50 = vstv %s406_s22  ;;  %v161_v54 = vmul.f32 %v160_v42, %v431_v0 }
  0x17   :  { %s420_s29 = sld [smem:[#allocation2 + $0x11]]  ;;  %v176_v58 = vstv %s408_s23  ;;  %v169_v62 = vmul.f32 %v168_v50, %v431_v0 }
  0x18   :  { %s285_s30 = sld [smem:[#allocation2 + $0x14]]  ;;  %v177_v7 = vmul.f32 %v176_v58, %v431_v0 }
  0x19   :  { %s422_s3 = sld [smem:[#allocation2 + $0x12]] }
  0x1a   :  { %s286_s4 = sld [smem:[#allocation2 + $0x15]] }
  0x1b   :  { %s424_s5 = sld [smem:[#allocation2 + $0x13]] }
  0x1c   :  { %s426_s6 = sld [smem:[#allocation2 + $0x16]] }
  0x1d   :  { %s433_s9 = sld [smem:[#allocation2 + $0x17]] }
  0x1e   :  { %s435_s10 = sld [smem:[#allocation2 + $0x18]]  ;;  %v89_v4 = vstv %s285_s30 }
  0x1f   :  { %s438_s11 = sld [smem:[#allocation2 + $0x19]]  ;;  %v90_v10 = vadd.f32 %v89_v4, %v88_v3  ;;  %v184_v3 = vstv %s410_s24 }
  0x20   :  { %s441_s12 = sld [smem:[#allocation2 + $0x28]]  ;;  %v98_v8 = vstv %s286_s4 }
  0x21   :  { %s444_s7 = sld [smem:[#allocation2 + $0x1a]]  ;;  %v99_v14 = vadd.f32 %v98_v8, %v97_v6  ;;  %v91_v19 = vmax.f32 %v90_v10, 0.0 }
  0x22   :  { %s448_s1 = sld [smem:[#allocation2 + $0x29]]  ;;  %v106_v12 = vstv %s426_s6 }
  0x23   :  { %s451_s13 = sld [smem:[#allocation2 + $0x1b]]  ;;  %v114_v15 = vstv %s433_s9  ;;  %v107_v20 = vadd.f32 %v106_v12, %v105_v11  ;;  %v100_v25 = vmax.f32 %v99_v14, 0.0  ;;  %v192_v11 = vstv %s412_s25 }
  0x24   :  { %s454_s14 = sld [smem:[#allocation2 + $0x2a]]  ;;  %v122_v18 = vstv %s435_s10  ;;  %v115_v23 = vadd.f32 %v114_v15, %v113_v13  ;;  %v185_v14 = vmul.f32 %v184_v3, %v431_v0  ;;  %v193_v21 = vmul.f32 %v192_v11, %v431_v0 }
  0x25   :  { %s458_s15 = sld [smem:[#allocation2 + $0x1c]]  ;;  %v123_v26 = vadd.f32 %v122_v18, %v121_v16  ;;  %v130_v27 = vstv %s438_s11  ;;  %v108_v32 = vmax.f32 %v107_v20, 0.0 }
  0x26   :  { %s463_s16 = sld [smem:[#allocation2 + $0x2b]]  ;;  %v92_v22 = vstv %s441_s12  ;;  %v116_v36 = vmax.f32 %v115_v23, 0.0  ;;  %v131_v37 = vadd.f32 %v130_v27, %v129_v24 }
  0x27   :  { %s466_s17 = sld [smem:[#allocation2 + $0x2c]]  ;;  %v93_v31 = vmul.f32 %v92_v22, %v91_v19  ;;  %v138_v33 = vstv %s444_s7  ;;  %v124_v40 = vmax.f32 %v123_v26, 0.0  ;;  %v200_v22 = vstv %s414_s26 }
  0x28   :  { %s469_s30 = sld [smem:[#allocation2 + $0x3c]]  ;;  %v101_v29 = vstv %s448_s1  ;;  %v139_v45 = vadd.f32 %v138_v33, %v137_v30  ;;  %v132_v52 = vmax.f32 %v131_v37, 0.0  ;;  %v208_v30 = vstv %s416_s27 }
  0x29   :  { %s473_s4 = sld [smem:[#allocation2 + $0x1d]]  ;;  %v102_v39 = vmul.f32 %v101_v29, %v100_v25  ;;  %v146_v41 = vstv %s451_s13  ;;  %v201_v34 = vmul.f32 %v200_v22, %v431_v0  ;;  %v209_v42 = vmul.f32 %v208_v30, %v431_v0 }
  0x2a   :  { %s477_s18 = sld [smem:[#allocation2 + $0x2d]]  ;;  %v109_v35 = vstv %s454_s14  ;;  %v147_v53 = vadd.f32 %v146_v41, %v145_v38  ;;  %v140_v60 = vmax.f32 %v139_v45, 0.0  ;;  %v216_v38 = vstv %s418_s28 }
  0x2b   :  { %s481_s19 = sld [smem:[#allocation2 + $0x1e]]  ;;  %v110_v48 = vmul.f32 %v109_v35, %v108_v32  ;;  %v154_v49 = vstv %s458_s15  ;;  %v217_v50 = vmul.f32 %v216_v38, %v431_v0 }
  0x2c   :  { %s485_s6 = sld [smem:[#allocation2 + $0x2e]]  ;;  %v117_v44 = vstv %s463_s16  ;;  %v155_v61 = vadd.f32 %v154_v49, %v153_v46  ;;  %v148_v5 = vmax.f32 %v147_v53, 0.0  ;;  %v224_v46 = vstv %s420_s29 }
  0x2d   :  { %s489_s0 = sld [smem:[#allocation2 + $0x1f]]  ;;  %v125_v51 = vstv %s466_s17  ;;  %v118_v56 = vmul.f32 %v117_v44, %v116_v36  ;;  %v225_v58 = vmul.f32 %v224_v46, %v431_v0 }
  0x2e   :  { %s493_s8 = sld [smem:[#allocation2 + $0x2f]]  ;;  %v94_v43 = vstv %s469_s30  ;;  %v126_v1 = vmul.f32 %v125_v51, %v124_v40  ;;  %v156_v17 = vmax.f32 %v155_v61, 0.0  ;;  %v240_v61 = vstv %s424_s5  ;;  %s369_s5 = smov [#allocation5]  }
  0x2f   :  { %s498_s20 = sld [smem:[#allocation2 + $0x20]]  ;;  %v95_v47 = vadd.f32 %v94_v43, %v93_v31  ;;  %v162_v57 = vstv %s473_s4  ;;  %s254_s16 = sshll.u32 %s369_s5, 4  ;;  %s255_s16 = int_to_ptr.vmem [resolvable:$true] %s254_s16 }
  0x30   :  { %s502_s9 = sld [smem:[#allocation2 + $0x30]]  ;;  %v133_v59 = vstv %s477_s18  ;;  %v163_v6 = vadd.f32 %v162_v57, %v161_v54  ;;  %v232_v54 = vstv %s422_s3  ;;  %s256_s4 = sshll.u32 %s586_s2, 4  ;;  %s257_s4 = int_to_ptr.hbm [resolvable:$true] %s256_s4 }
  0x31   :  { %s506_s21 = sld [smem:[#allocation2 + $0x21]]  ;;  %v103_v55 = vadd.f32 %v102_v39, %v95_v47  ;;  %v170_v2 = vstv %s481_s19  ;;  %v134_v9 = vmul.f32 %v133_v59, %v132_v52 }
  0x32   :  { %s510_s10 = sld [smem:[#allocation2 + $0x31]]  ;;  %v141_v4 = vstv %s485_s6  ;;  %v171_v13 = vadd.f32 %v170_v2, %v169_v62  ;;  %v164_v25 = vmax.f32 %v163_v6, 0.0  ;;  %v233_v2 = vmul.f32 %v232_v54, %v431_v0 }
  0x33   :  { %s514_s22 = sld [smem:[#allocation2 + $0x32]]  ;;  %v111_v63 = vadd.f32 %v110_v48, %v103_v55  ;;  %v178_v10 = vstv %s489_s0  ;;  %v142_v16 = vmul.f32 %v141_v4, %v140_v60 }
  0x34   :  { %s518_s11 = sld [smem:[#allocation2 + $0x22]]  ;;  %v149_v12 = vstv %s493_s8  ;;  %v179_v20 = vadd.f32 %v178_v10, %v177_v7  ;;  %v172_v28 = vmax.f32 %v171_v13, 0.0 }
  0x35   :  { %s522_s23 = sld [smem:[#allocation2 + $0x33]]  ;;  %v119_v8 = vadd.f32 %v118_v56, %v111_v63  ;;  %v186_v18 = vstv %s498_s20  ;;  %v150_v24 = vmul.f32 %v149_v12, %v148_v5 }
  0x36   :  { %s526_s12 = sld [smem:[#allocation2 + $0x23]]  ;;  %v157_v19 = vstv %s502_s9  ;;  %v187_v29 = vadd.f32 %v186_v18, %v185_v14  ;;  %v180_v35 = vmax.f32 %v179_v20, 0.0 }
  0x37   :  { %s530_s24 = sld [smem:[#allocation2 + $0x34]]  ;;  %v127_v15 = vadd.f32 %v126_v1, %v119_v8  ;;  %v194_v26 = vstv %s506_s21  ;;  %v158_v32 = vmul.f32 %v157_v19, %v156_v17 }
  0x38   :  { %s533_s7 = sld [smem:[#allocation2 + $0x24]]  ;;  %v165_v27 = vstv %s510_s10  ;;  %v195_v36 = vadd.f32 %v194_v26, %v193_v21  ;;  %v188_v44 = vmax.f32 %v187_v29, 0.0 }
  0x39   :  { %s538_s25 = sld [smem:[#allocation2 + $0x35]]  ;;  %v135_v23 = vadd.f32 %v134_v9, %v127_v15  ;;  %v173_v33 = vstv %s514_s22  ;;  %v166_v40 = vmul.f32 %v165_v27, %v164_v25  ;;  %v241_v9 = vmul.f32 %v240_v61, %v431_v0 }
  0x3a   :  { %s541_s1 = sld [smem:[#allocation2 + $0x25]]  ;;  %v202_v37 = vstv %s518_s11  ;;  %v174_v43 = vmul.f32 %v173_v33, %v172_v28  ;;  %v196_v52 = vmax.f32 %v195_v36, 0.0 }
  0x3b   :  { %s545_s13 = sld [smem:[#allocation2 + $0x26]]  ;;  %v143_v31 = vadd.f32 %v142_v16, %v135_v23  ;;  %v181_v41 = vstv %s522_s23  ;;  %v203_v49 = vadd.f32 %v202_v37, %v201_v34 }
  0x3c   :  { %s549_s26 = sld [smem:[#allocation2 + $0x36]]  ;;  %v210_v45 = vstv %s526_s12  ;;  %v182_v51 = vmul.f32 %v181_v41, %v180_v35 }
  0x3d   :  { %s553_s14 = sld [smem:[#allocation2 + $0x27]]  ;;  %v151_v39 = vadd.f32 %v150_v24, %v143_v31  ;;  %v189_v48 = vstv %s530_s24  ;;  %v211_v57 = vadd.f32 %v210_v45, %v209_v42  ;;  %v204_v63 = vmax.f32 %v203_v49, 0.0 }
  0x3e   :  { %s557_s27 = sld [smem:[#allocation2 + $0x37]]  ;;  %v218_v53 = vstv %s533_s7  ;;  %v190_v59 = vmul.f32 %v189_v48, %v188_v44 }
  0x3f   :  { %v159_v47 = vadd.f32 %v158_v32, %v151_v39  ;;  %s563_s28 = sld [smem:[#allocation2 + $0x38]]  ;;  %v197_v56 = vstv %s538_s25  ;;  %v219_v1 = vadd.f32 %v218_v53, %v217_v50  ;;  %v212_v7 = vmax.f32 %v211_v57, 0.0 }
  0x40   :  { %s569_s29 = sld [smem:[#allocation2 + $0x39]]  ;;  %v226_v60 = vstv %s541_s1  ;;  %v198_v3 = vmul.f32 %v197_v56, %v196_v52 }
  0x41   :  { %v167_v55 = vadd.f32 %v166_v40, %v159_v47  ;;  %s323_s3 = sld [smem:[#allocation2 + $0x3a]]  ;;  %v234_v5 = vstv %s545_s13  ;;  %v227_v8 = vadd.f32 %v226_v60, %v225_v58  ;;  %v220_v14 = vmax.f32 %v219_v1, 0.0 }
  0x42   :  { %v205_v4 = vstv %s549_s26  ;;  %s324_s15 = sld [smem:[#allocation2 + $0x3b]]  ;;  %v235_v15 = vadd.f32 %v234_v5, %v233_v2 }
  0x43   :  { %v175_v62 = vadd.f32 %v174_v43, %v167_v55  ;;  %v242_v11 = vstv %s553_s14  ;;  %v206_v13 = vmul.f32 %v205_v4, %v204_v63  ;;  %v228_v19 = vmax.f32 %v227_v8, 0.0 }
  0x44   :  { %v213_v10 = vstv %s557_s27  ;;  %v243_v20 = vadd.f32 %v242_v11, %v241_v9  ;;  %v236_v24 = vmax.f32 %v235_v15, 0.0 }
  0x45   :  { %v183_v6 = vadd.f32 %v182_v51, %v175_v62  ;;  %v221_v16 = vstv %s563_s28  ;;  %v214_v18 = vmul.f32 %v213_v10, %v212_v7 }
  0x46   :  { %v229_v21 = vstv %s569_s29  ;;  %v222_v23 = vmul.f32 %v221_v16, %v220_v14  ;;  %v244_v0 = vmax.f32 %v243_v20, 0.0 }
  0x47   :  { %v191_v12 = vadd.f32 %v190_v59, %v183_v6  ;;  %v237_v25 = vstv %s323_s3  ;;  %v230_v27 = vmul.f32 %v229_v21, %v228_v19 }
  0x48   :  { %v245_v28 = vstv %s324_s15  ;;  %v238_v30 = vmul.f32 %v237_v25, %v236_v24 }
  0x49   :  { %v199_v17 = vadd.f32 %v198_v3, %v191_v12  ;;  %v246_v32 = vmul.f32 %v245_v28, %v244_v0 }
  0x4b   :  { %v207_v22 = vadd.f32 %v206_v13, %v199_v17 }
  0x4d   :  { %v215_v26 = vadd.f32 %v214_v18, %v207_v22 }
  0x4f   :  { %v223_v29 = vadd.f32 %v222_v23, %v215_v26 }
  0x51   :  { %v231_v31 = vadd.f32 %v230_v27, %v223_v29 }
  0x53   :  { %v239_v33 = vadd.f32 %v238_v30, %v231_v31 }
  0x55   :  { %v247_v34 = vadd.f32 %v246_v32, %v239_v33 }
  0x57   :  { %248 = vst [vmem:[#allocation5] sm:$0xff] %v247_v34 }
  0x58   :  { %259 = dma.vmem_to_hbm [thread:$0]  %s255_s16, 128, %s257_s4, [#allocation3]  }
  0x59   :  { %366 = dma.done.wait [#allocation3], 128  }
  0x5a   :  { %367 = vsyncadd [#allocation3], 4294967168 }
  0x5b   :  { %264 = vsyncpa [#allocation3], 1 }
  0x5c   :  { %265 = vsyncpa [#allocation4], 1 }

</bundles_post_ra>
